<compile_context>
chip_gen: v7x
topology: tpu7x:2x2x1
jax: 0.10.0
libtpu: 0.0.40
codegen_flags: <defaults>
</compile_context>

<pallas_src>
import functools

import jax
import jax.numpy as jnp
from jax.experimental import pallas as pl
from jax.experimental.pallas import tpu as pltpu


def _pooler_kernel(x_ref, w_ref, b_ref, o_ref):
    # x_ref: [B, H]   first token, compute dtype, resident across the grid
    # w_ref: [TN, H]  one output-column tile of the Linear weight (stored dtype)
    # b_ref: [1, H]   full f32 bias, resident across the grid
    # o_ref: [B, TN]
    tn = o_ref.shape[1]
    H = b_ref.shape[1]

    x = x_ref[...]                                   # already in compute dtype
    w = w_ref[...].astype(x.dtype)                   # VPU cast; free in mem-bound regime
    # y[b, n] = sum_k x[b, k] * w[n, k]  -- contraction on the last dim of both,
    # so the MXU consumes W in its native [out, in] layout (no transposed tile).
    y = jax.lax.dot_general(
        x, w,
        dimension_numbers=(((1,), (1,)), ((), ())),
        preferred_element_type=jnp.float32)          # [B, TN] f32 accumulation

    if tn == H:
        b = b_ref[...]                               # single-tile path: no slicing
    else:
        # Multi-tile path: tn is guaranteed to be a 128-multiple by _pick_tile_n.
        start = pl.multiple_of(pl.program_id(0) * tn, 128)
        b = b_ref[:, pl.ds(start, tn)]               # (1, TN), broadcasts over B

    o_ref[...] = jnp.tanh(y + b).astype(o_ref.dtype)


def _pick_tile_n(H, w_itemsize, vmem_budget_bytes=48 * 1024 * 1024):
    """Pick the output-column tile size, minimizing grid steps."""
    def fits(tn):
        # Double-buffered weight tile is the dominant VMEM consumer.
        return 2 * tn * H * w_itemsize <= vmem_budget_bytes

    if H % 256 == 0 and fits(H // 2):
        return H // 2        # grid_n = 2: balanced 2-way TensorCore split on v7x
    if fits(H):
        return H             # grid_n = 1: minimal per-step overhead
    # Large-H fallback: largest 128-multiple divisor of H that fits VMEM.
    tn = (H // 128) * 128
    while tn >= 128:
        if H % tn == 0 and fits(tn):
            return tn
        tn -= 128
    return H                 # last resort (full tile; vmem_limit is raised below)


def _pad_bytes(rows, cols, itemsize):
    # (8, 128) sublane x lane padding of a VMEM tile.
    return ((rows + 7) // 8 * 8) * ((cols + 127) // 128 * 128) * itemsize


@functools.partial(jax.jit, static_argnames=("compute_dtype",))
def gpt2_pooler(hidden_states, weight, bias, *, compute_dtype=jnp.bfloat16):
    """hidden_states: [B, S, H]; weight: [H, H] (out, in); bias: [H] -> [B, H]."""
    B, S, H = hidden_states.shape
    assert weight.shape == (H, H)
    assert bias.shape == (H,)

    out_dtype = hidden_states.dtype
    w_itemsize = jnp.dtype(weight.dtype).itemsize
    x_itemsize = jnp.dtype(compute_dtype).itemsize
    tile_n = _pick_tile_n(H, w_itemsize)
    grid_n = H // tile_n

    # First token only: tiny slice + one-time cast in the wrapper (B*H elems).
    x = hidden_states[:, 0, :].astype(compute_dtype)
    b2 = bias.reshape(1, H).astype(jnp.float32)

    # VMEM footprint: double-buffered (padded) tiles; weight tile dominates.
    footprint = (2 * _pad_bytes(tile_n, H, w_itemsize)      # weight tile
                 + 2 * _pad_bytes(B, H, x_itemsize)          # resident x
                 + 2 * _pad_bytes(1, H, 4)                   # resident bias
                 + 2 * _pad_bytes(B, tile_n, jnp.dtype(out_dtype).itemsize))
    vmem_limit = int(min(64 * 1024 * 1024, max(2 * footprint, 4 * 1024 * 1024)))

    cost = pl.CostEstimate(
        flops=2 * B * H * H,
        transcendentals=B * H,
        bytes_accessed=(H * H * w_itemsize            # weight (dominant HBM read)
                        + B * H * x_itemsize          # first token
                        + H * 4                       # bias
                        + B * H * jnp.dtype(out_dtype).itemsize),  # output
    )

    # NOTE(v5e): the ((1,),(1,)) contraction is intended to lower without a
    # per-tile XLU transpose of the weight tile; if a bundle dump shows a
    # vxpose, store the pooler weight pre-transposed [in, out] instead.
    out = pl.pallas_call(
        _pooler_kernel,
        out_shape=jax.ShapeDtypeStruct((B, H), out_dtype),
        grid_spec=pltpu.PrefetchScalarGridSpec(
            num_scalar_prefetch=0,
            grid=(grid_n,),
            in_specs=[
                # Resident first-token activations (constant index map).
                pl.BlockSpec((B, H), lambda j: (0, 0)),
                # Stream lane-dense weight tiles along H_out (PyTorch layout).
                pl.BlockSpec((tile_n, H), lambda j: (j, 0)),
                # Resident full bias.
                pl.BlockSpec((1, H), lambda j: (0, 0)),
            ],
            out_specs=pl.BlockSpec((B, tile_n), lambda j: (0, j)),
        ),
        compiler_params=pltpu.CompilerParams(
            # Output-column tiles are fully independent -> sharded across
            # TensorCores on v7x (grid_n=2 gives a balanced split); neutral on
            # v5e/v6e.
            dimension_semantics=("parallel",),
            vmem_limit_bytes=vmem_limit,
        ),
        cost_estimate=cost,
    )(x, weight, b2)
    return out


def _ref_pooler_f32(hidden_states, weight, bias):
    x = hidden_states[:, 0, :].astype(jnp.float32)
    return jnp.tanh(x @ weight.astype(jnp.float32).T + bias.astype(jnp.float32))


def _ref_pooler_bf16(hidden_states, weight, bias):
    # Same bf16-operand / f32-accumulation recipe as the default kernel path.
    x = hidden_states[:, 0, :].astype(jnp.bfloat16)
    w = weight.astype(jnp.bfloat16)
    y = jax.lax.dot_general(x, w, dimension_numbers=(((1,), (1,)), ((), ())),
                            preferred_element_type=jnp.float32)
    return jnp.tanh(y + bias.astype(jnp.float32))


if __name__ == "__main__":
    key = jax.random.PRNGKey(0)

    # (B, S, H): hidden=32 matches a tiny config.n_embd; H=256 exercises the
    # 2-tile (grid_n=2) weight-streaming / TensorCore-split path.
    for (B, S, H) in ((2, 8, 32), (2, 4, 256)):
        key, k_hs, k_w, k_b = jax.random.split(key, 4)
        hidden_states = jax.random.normal(k_hs, (B, S, H), dtype=jnp.float32)
        weight = jax.random.normal(k_w, (H, H), dtype=jnp.float32) * 0.02
        bias = jax.random.normal(k_b, (H,), dtype=jnp.float32) * 0.02

        ref_bf16 = _ref_pooler_bf16(hidden_states, weight, bias)
        ref_f32 = _ref_pooler_f32(hidden_states, weight, bias)

        # Default bf16-compute path (halved MXU-operand width, f32 accumulation).
        out = jax.block_until_ready(gpt2_pooler(hidden_states, weight, bias))
        assert out.shape == (B, H)
        assert out.dtype == hidden_states.dtype
        assert jnp.allclose(out.astype(jnp.float32), ref_bf16, atol=2e-3, rtol=2e-3)
        assert jnp.allclose(out.astype(jnp.float32), ref_f32, atol=5e-2, rtol=5e-2)

        # f32 compute opt-out path (numerics parity with the PyTorch reference).
        out_f32 = jax.block_until_ready(
            gpt2_pooler(hidden_states, weight, bias, compute_dtype=jnp.float32))
        assert out_f32.shape == (B, H)
        assert jnp.allclose(out_f32, ref_f32, atol=2e-3, rtol=2e-3)

    print("KERNEL_OK")
</pallas_src>

<mosaic_0001>
module attributes {stable_mosaic.version = 11 : i64} {
  func.func @_pooler_kernel(%arg0: i32, %arg1: memref<2x32xbf16, #tpu.memory_space<vmem>>, %arg2: memref<32x32xf32, #tpu.memory_space<vmem>>, %arg3: memref<1x32xf32, #tpu.memory_space<vmem>>, %arg4: memref<2x32xf32, #tpu.memory_space<vmem>>) attributes {dimension_semantics = [#tpu.dimension_semantics<parallel>], iteration_bounds = array<i64: 1>, scalar_prefetch = 0 : i64, scratch_operands = 0 : i64, tpu.core_type = #tpu.core_type<tc>, window_params = [{pipeline_mode = #tpu.pipeline_mode<synchronous>, transform_indices = @transform_0, window_bounds = array<i64: 2, 32>}, {transform_indices = @transform_1, window_bounds = array<i64: 32, 32>}, {pipeline_mode = #tpu.pipeline_mode<synchronous>, transform_indices = @transform_2, window_bounds = array<i64: 1, 32>}, {transform_indices = @transform_3, window_bounds = array<i64: 2, 32>}]} {
    %c0 = arith.constant 0 : index
    %c0_0 = arith.constant 0 : index
    %0 = vector.load %arg1[%c0, %c0_0] : memref<2x32xbf16, #tpu.memory_space<vmem>>, vector<2x32xbf16>
    %c0_1 = arith.constant 0 : index
    %c0_2 = arith.constant 0 : index
    %1 = vector.load %arg2[%c0_1, %c0_2] : memref<32x32xf32, #tpu.memory_space<vmem>>, vector<32x32xf32>
    %2 = arith.truncf %1 : vector<32x32xf32> to vector<32x32xbf16>
    %cst = arith.constant dense<0.000000e+00> : vector<2x32xf32>
    %3 = tpu.matmul %0, %2, %cst {dimension_numbers = #tpu.dot_dimension_numbers<[1], [1], [0], [0], [0, 0, 1, 0], [], []>} : vector<2x32xbf16>, vector<32x32xbf16>, vector<2x32xf32> -> vector<2x32xf32>
    %c0_3 = arith.constant 0 : index
    %c0_4 = arith.constant 0 : index
    %4 = vector.load %arg3[%c0_3, %c0_4] : memref<1x32xf32, #tpu.memory_space<vmem>>, vector<1x32xf32>
    %5 = vector.broadcast %4 : vector<1x32xf32> to vector<2x32xf32>
    %6 = arith.addf %3, %5 : vector<2x32xf32>
    %7 = math.tanh %6 : vector<2x32xf32>
    %c0_5 = arith.constant 0 : index
    %c0_6 = arith.constant 0 : index
    %8 = vector.load %arg4[%c0_5, %c0_6] : memref<2x32xf32, #tpu.memory_space<vmem>>, vector<2x32xf32>
    tpu.vector_store %arg4[%c0_5, %c0_6], %7 {strides = array<i32>} : memref<2x32xf32, #tpu.memory_space<vmem>>, vector<2x32xf32>,
    return
  }
  func.func @transform_0(%arg0: i32) -> (i32, i32) {
    %c0_i32 = arith.constant 0 : i32
    %c0_i32_0 = arith.constant 0 : i32
    %c0_i32_1 = arith.constant 0 : i32
    return %c0_i32, %c0_i32_0 : i32, i32
  }
  func.func @transform_1(%arg0: i32) -> (i32, i32) {
    %c0_i32 = arith.constant 0 : i32
    %c0_i32_0 = arith.constant 0 : i32
    return %arg0, %c0_i32 : i32, i32
  }
  func.func @transform_2(%arg0: i32) -> (i32, i32) {
    %c0_i32 = arith.constant 0 : i32
    %c0_i32_0 = arith.constant 0 : i32
    %c0_i32_1 = arith.constant 0 : i32
    return %c0_i32, %c0_i32_0 : i32, i32
  }
  func.func @transform_3(%arg0: i32) -> (i32, i32) {
    %c0_i32 = arith.constant 0 : i32
    %c0_i32_0 = arith.constant 0 : i32
    return %c0_i32, %arg0 : i32, i32
  }
}

</mosaic_0001>

<bundles_post_ra>
// kernel: gpt2_pooler.1
= control target key start
LH: loop header
LB: loop body
LE: loop exit
PB: predicated region body
PF: predicated region fallthrough
CT: control target
= control target key end

     0   :  { %8 = vsyncpa [#allocation3], 0  ;;  %s237_s0 = inlined_call_operand.vmem [shape: bf16[2,32], index: 0, kind: input, shape index: {}]   ;;  %s238_s1 = inlined_call_operand.hbm [shape: f32[32,32], index: 1, kind: input, shape index: {}]   ;;  %s239_s2 = inlined_call_operand.vmem [shape: f32[1,32], index: 2, kind: input, shape index: {}]   ;;  %s240_s3 = inlined_call_operand.hbm [shape: f32[2,32], index: 3, kind: output, shape index: {}]  }
   0x1   :  { %9 = vsyncpa [#allocation4], 0  ;;  %s181_s12 = smov [#allocation2]   ;;  %s133_s16 = scalar_lea.hbm %s238_s1, 512 }
   0x2   :  { %s17_s13 = sshll.u32 %s181_s12, 4  ;;  %p134_p0 = scmp.ne.s32.totalorder %s238_s1, %s133_s16  ;;  %s18_s13 = int_to_ptr.vmem [resolvable:$true] %s17_s13 }
   0x3   :  { %p137_p1 = scmp.lt.u32.totalorder %s133_s16, %s238_s1 }
   0x5   :  { %p139_p2 = pnand %p137_p1, %p134_p0 }
   0x7   :  { %142 = shalt.err (!%p139_p2)
}
   0x8   :  { %s143_s21 = scalar_lea.vmem %s18_s13, 512  ;;  %p148_p4 = scmp.lt.s32.totalorder %s18_s13, %s18_s13 }
   0x9   :  { %p144_p3 = scmp.ne.s32.totalorder %s18_s13, %s143_s21  ;;  %p149_p5 = scmp.lt.s32.totalorder %s143_s21, %s143_s21 }
   0xb   :  { %p150_p6 = por %p149_p5, %p148_p4 }
   0xd   :  { %p151_p7 = pnand %p150_p6, %p144_p3 }
   0xf   :  { %154 = shalt.err (!%p151_p7)
}
  0x10   :  { %s182_s22 = smov 128   ;;  %s183_s23 = smov 8  }
  0x11   :  { %23 = dma.hbm_to_vmem [thread:$0]  %s238_s1, 512, %s18_s13, [#allocation3], %s182_s22, %s182_s22, %s183_s23  }
  0x12   :  { %177 = dma.done.wait [#allocation3], 512  }
  0x13   :  { %178 = vsyncadd [#allocation3], 4294966784  ;;  %v184_v0 = vmov 0.0   ;;  %vm185_vm0 = vmmov 0   ;;  %v31_v1 = vld [vmem:[#allocation2] sm:$0xff]  ;;  %v32_v2 = vld [vmem:[#allocation2 + $0x8] sm:$0xff] }
  0x14   :  { %117 = vmatprep.subr.bf16.mxu0 %v184_v0  ;;  %121 = vmatprep.mubr.msk.bf16.mxu0 %vm185_vm0, %v184_v0  ;;  %vm44_vm1 = vcmask 261120   ;;  %v35_v3 = vpack.c.bf16 %v32_v2, %v31_v1  ;;  %v33_v4 = vld [vmem:[#allocation2 + $0x10] sm:$0xff]  ;;  %v34_v5 = vld [vmem:[#allocation2 + $0x18] sm:$0xff]  ;;  %v30_v9 = vld [vmem:[%s237_s0] sm:$0x1]  ;;  %s186_s29 = smov [#allocation5]  }
  0x15   :  { %v36_v7 = vpack.c.bf16 %v34_v5, %v33_v4  ;;  %v112_v10 = vld [vmem:[%s239_s2] ss:$0 sm:$0xff]  ;;  %s103_s30 = sshll.u32 %s186_s29, 4  ;;  %vm95_vm2 = vcmask 254976   ;;  %s104_s30 = int_to_ptr.vmem [resolvable:$true] %s103_s30 }
  0x16   :  { %v49_v6 = vsel %vm44_vm1, %v35_v3, 0  ;;  %s155_s4 = scalar_lea.vmem %s104_s30, 32  ;;  %p160_p9 = scmp.lt.s32.totalorder %s104_s30, %s104_s30 }
  0x17   :  { %118 = vmatpush3.bf16.xpose.msra.mxu0 %v49_v6  ;;  %v52_v8 = vsel %vm44_vm1, %v36_v7, 0  ;;  %p156_p8 = scmp.ne.s32.totalorder %s104_s30, %s155_s4  ;;  %p161_p10 = scmp.lt.s32.totalorder %s155_s4, %s155_s4 }
  0x18   :  { %119 = vmatprep.subr.bf16.mxu0 %v184_v0 }
  0x19   :  { %p162_p11 = por %p161_p10, %p160_p9 }
  0x1b   :  { %p163_p12 = pnand %p162_p11, %p156_p8 }
  0x1f   :  { %120 = vmatpush3.bf16.xpose.msra.mxu0 %v52_v8 }
  0x26   :  { %122 = vmatmul.mubr.msk.bf16.vlgmr.msra.gmra.mrb[0].mxu0 %vm44_vm1, %v30_v9 }
  0xf9   :  { %v88_v11 = vpop.f32.mrb[0].mxu0 }
  0xfa   :  { %v89_v12 = vadd.f32 %v112_v10, %v88_v11  ;;  %v123_v13 = vpop.f32.mrb[1].mxu0 }
  0xfb   :  { %v91_v14 = vpop.f32.mrb[2].mxu0 }
  0xfc   :  { %131 = vtanh.f32 %v89_v12  ;;  %v124_v15 = vpop.f32.mrb[3].mxu0 }
 0x106   :  { %v132_v16 = vpop.eup %131 }
 0x107   :  { %96 = vst.msk [vmem:[#allocation5] sm:$0x3] %vm95_vm2, %v132_v16 }
 0x108   :  { %166 = shalt.err (!%p163_p12)
}
 0x109   :  { %s167_s5 = scalar_lea.hbm %s240_s3, 32 }
 0x10a   :  { %p168_p13 = scmp.ne.s32.totalorder %s240_s3, %s167_s5  ;;  %p171_p0 = scmp.lt.u32.totalorder %s167_s5, %s240_s3 }
 0x10c   :  { %p173_p1 = pnand %p171_p0, %p168_p13 }
 0x10e   :  { %176 = shalt.err (!%p173_p1)
}
 0x10f   :  { %106 = dma.vmem_to_hbm [thread:$0]  %s104_s30, 32, %s240_s3, [#allocation4]  }
 0x110   :  { %179 = dma.done.wait [#allocation4], 32  }
 0x111   :  { %180 = vsyncadd [#allocation4], 4294967264 }
 0x112   :  { %110 = vsyncpa [#allocation3], 1 }
 0x113   :  { %111 = vsyncpa [#allocation4], 1 }

</bundles_post_ra>
